<compile_context>
chip_gen: v7x
topology: tpu7x:2x2x1
jax: 0.10.0
libtpu: 0.0.40
codegen_flags: <defaults>
</compile_context>

<pallas_src>
import math
from functools import partial

import numpy as np
import jax
import jax.numpy as jnp
from jax.experimental import pallas as pl
from jax.experimental.pallas import tpu as pltpu


_LANE = 128
# Per-buffer VMEM tile budget.  in + out double-buffered => 4 live buffers
# (~32 MiB), covered by the explicit 48 MiB scoped-VMEM limit below.
_TILE_BYTES = 8 * 1024 * 1024
_VMEM_LIMIT_BYTES = 48 << 20


def _sublane_pack(dtype):
    """Rows per vreg sublane group: 8 for f32, 16 for bf16, 32 for int8/fp8."""
    itemsize = jnp.dtype(dtype).itemsize
    return max(8, 32 // max(itemsize, 1))


def _pick_tile_rows(rows, dtype):
    """Pick a tile row count: sublane-packed, ~_TILE_BYTES, prefer exact divisor."""
    sub = _sublane_pack(dtype)
    bytes_per_row = _LANE * jnp.dtype(dtype).itemsize
    target = max(sub, (_TILE_BYTES // bytes_per_row) // sub * sub)
    if rows <= target:
        return rows  # single full-extent block — (8,128) rule satisfied by full dims
    # Prefer a tile that divides rows (no masked final block), but do not
    # shrink below half the target tile size.
    t = target
    floor = max(sub, target // 2)
    while t >= floor:
        if rows % t == 0:
            return t
        t -= sub
    return target


def _make_tile_kernel(tile_fn):
    def kernel(x_ref, o_ref):
        # tile_fn sees a lane-dense (tile_rows, 128) slab of the flattened
        # (B, *feature_shape) batch; suitable for elementwise transforms.
        o_ref[...] = tile_fn(x_ref[...]).astype(o_ref.dtype)

    return kernel


@partial(jax.jit, static_argnums=1)
def _tiled_elementwise(x_batch, tile_fn):
    """Apply an elementwise per-tile transform over a lane-dense tiling of x_batch."""
    shape = x_batch.shape
    dtype = x_batch.dtype
    total = math.prod(shape)

    # Pad the flattened array to a multiple of 128 so every store is a
    # full-width lane-dense vst (review: ragged-fallback fix).
    pad = (-total) % _LANE
    flat = x_batch.reshape(total)
    if pad:
        flat = jnp.pad(flat, (0, pad))
    padded = total + pad
    rows = padded // _LANE
    x2 = flat.reshape(rows, _LANE)

    tile_rows = _pick_tile_rows(rows, dtype)
    grid = (pl.cdiv(rows, tile_rows),)
    block = (tile_rows, _LANE)
    nbytes = padded * jnp.dtype(dtype).itemsize

    y2 = pl.pallas_call(
        _make_tile_kernel(tile_fn),
        out_shape=jax.ShapeDtypeStruct((rows, _LANE), dtype),
        grid=grid,
        in_specs=[pl.BlockSpec(block, lambda i: (i, 0))],
        out_specs=pl.BlockSpec(block, lambda i: (i, 0)),
        compiler_params=pltpu.CompilerParams(
            dimension_semantics=("parallel",),
            vmem_limit_bytes=_VMEM_LIMIT_BYTES,
        ),
        cost_estimate=pl.CostEstimate(
            flops=0, transcendentals=0, bytes_accessed=2 * nbytes
        ),
    )(x2)

    out = y2.reshape(padded)
    if pad:
        out = out[:total]
    return out.reshape(shape)


class FeatureBase:
    """JAX/Pallas mirror of molgym FeatureBase (dense batch_forward path)."""

    # Subclasses install a non-identity elementwise per-tile transform here to
    # route batch_forward through the Pallas kernel.  None => identity forward
    # and batch_forward is a metadata-only return (no kernel, no HBM traffic).
    _tile_transform = None

    def __init__(self, feature_shape, device=None):
        # feature_shape: shape of a single element's forward() output, any rank.
        self.feature_shape = tuple(feature_shape)
        self.device = device

    @property
    def is_sparse(self):
        # TODO(synk): abstract in the PyTorch spec; dense placeholder so the
        # torch.stack path (the only compute path) is exercised.
        return False

    @property
    def out_dim(self):
        # TODO(synk): abstract in the PyTorch spec; flat feature size placeholder.
        return int(np.prod(self.feature_shape)) if self.feature_shape else 1

    def forward(self, x, **kwargs):
        # TODO(synk): abstract in the PyTorch spec (raises NotImplementedError);
        # identity is the faithful dense placeholder; subclasses with a
        # _tile_transform get the Pallas path.
        if self._tile_transform is None:
            return x
        return _tiled_elementwise(x[None], self._tile_transform)[0]

    def batch_forward(self, x_batch, **kwargs):
        """x_batch: (B, *feature_shape) array -> stacked (B, *feature_shape)."""
        if self.is_sparse:
            # Sparse / list path of the PyTorch batch_forward returns a Python
            # list and involves no tensor stacking — nothing to kernelize.
            return [self.forward(x, **kwargs) for x in x_batch]
        if self._tile_transform is None:
            # Identity forward: torch.stack([x for x in x_batch]) == x_batch.
            # Metadata-only return — skips the kernel entirely (review item 1).
            return x_batch
        return _tiled_elementwise(x_batch, self._tile_transform)

    def to(self, device):
        self.device = device
        return self


class _ScaleShiftFeature(FeatureBase):
    """Example subclass: non-identity per-element transform exercising the Pallas hook."""

    @staticmethod
    def _tile_transform(tile):
        return tile * 2.0 + 1.0


if __name__ == "__main__":
    key = jax.random.PRNGKey(0)
    B, C, H, W = 2, 4, 16, 16
    x = jax.random.normal(key, (B, C, H, W), dtype=jnp.float32)
    x_np = np.asarray(x)

    # 1) Base class: identity forward => batch_forward short-circuits (no kernel).
    base = FeatureBase(feature_shape=(C, H, W))
    out_base = jax.block_until_ready(base.batch_forward(x))
    assert out_base.shape == (B, C, H, W)
    assert np.allclose(np.asarray(out_base), x_np), "identity batch_forward mismatch"

    # 2) Subclass hook: non-identity transform through the lane-dense Pallas kernel.
    feat = _ScaleShiftFeature(feature_shape=(C, H, W))
    out = jax.block_until_ready(feat.batch_forward(x))
    assert out.shape == (B, C, H, W)
    assert np.allclose(np.asarray(out), x_np * 2.0 + 1.0, rtol=1e-6, atol=1e-6), (
        "scale-shift batch_forward mismatch"
    )

    # 3) Ragged total (not a multiple of 128): pad-to-lane route through the
    #    same tiled kernel, sliced back afterwards.
    xr = jax.random.normal(jax.random.PRNGKey(1), (2, 3, 5, 7), dtype=jnp.float32)
    out_r = jax.block_until_ready(feat.batch_forward(xr))
    assert out_r.shape == xr.shape
    assert np.allclose(np.asarray(out_r), np.asarray(xr) * 2.0 + 1.0,
                       rtol=1e-6, atol=1e-6), "ragged batch_forward mismatch"

    print("KERNEL_OK")
</pallas_src>

<mosaic_0001>
module attributes {stable_mosaic.version = 11 : i64} {
  func.func @kernel(%arg0: i32, %arg1: memref<16x128xf32, #tpu.memory_space<vmem>>, %arg2: memref<16x128xf32, #tpu.memory_space<vmem>>) attributes {dimension_semantics = [#tpu.dimension_semantics<parallel>], iteration_bounds = array<i64: 1>, scalar_prefetch = 0 : i64, scratch_operands = 0 : i64, tpu.core_type = #tpu.core_type<tc>, window_params = [{transform_indices = @transform_0, window_bounds = array<i64: 16, 128>}, {transform_indices = @transform_1, window_bounds = array<i64: 16, 128>}]} {
    %c0 = arith.constant 0 : index
    %c0_0 = arith.constant 0 : index
    %0 = vector.load %arg1[%c0, %c0_0] : memref<16x128xf32, #tpu.memory_space<vmem>>, vector<16x128xf32>
    %cst = arith.constant 2.000000e+00 : f32
    %1 = vector.broadcast %cst : f32 to vector<16x128xf32>
    %2 = arith.mulf %0, %1 : vector<16x128xf32>
    %cst_1 = arith.constant 1.000000e+00 : f32
    %3 = vector.broadcast %cst_1 : f32 to vector<16x128xf32>
    %4 = arith.addf %2, %3 : vector<16x128xf32>
    %c0_2 = arith.constant 0 : index
    %c0_3 = arith.constant 0 : index
    %5 = vector.load %arg2[%c0_2, %c0_3] : memref<16x128xf32, #tpu.memory_space<vmem>>, vector<16x128xf32>
    tpu.vector_store %arg2[%c0_2, %c0_3], %4 {strides = array<i32>} : memref<16x128xf32, #tpu.memory_space<vmem>>, vector<16x128xf32>,
    return
  }
  func.func @transform_0(%arg0: i32) -> (i32, i32) {
    %c0_i32 = arith.constant 0 : i32
    %c0_i32_0 = arith.constant 0 : i32
    return %arg0, %c0_i32 : i32, i32
  }
  func.func @transform_1(%arg0: i32) -> (i32, i32) {
    %c0_i32 = arith.constant 0 : i32
    %c0_i32_0 = arith.constant 0 : i32
    return %arg0, %c0_i32 : i32, i32
  }
}

</mosaic_0001>

<bundles_post_ra>
// kernel: _tiled_elementwise.1
= control target key start
LH: loop header
LB: loop body
LE: loop exit
PB: predicated region body
PF: predicated region fallthrough
CT: control target
= control target key end

     0   :  { %s42_s0 = inlined_call_operand.vmem [shape: f32[16,128], index: 0, kind: input, shape index: {}]   ;;  %s43_s1 = inlined_call_operand.vmem [shape: f32[16,128], index: 1, kind: output, shape index: {}]  }
   0x1   :  { %v8_v0 = vld [vmem:[%s42_s0] sm:$0xff]  ;;  %v9_v1 = vld [vmem:[%s42_s0 + $0x8] sm:$0xff] }
   0x2   :  { %v10_v2 = vmul.f32 2.0, %v8_v0  ;;  %v11_v3 = vmul.f32 2.0, %v9_v1 }
   0x4   :  { %v12_v4 = vadd.f32 1.0, %v10_v2  ;;  %v13_v5 = vadd.f32 1.0, %v11_v3 }
   0x6   :  { %14 = vst [vmem:[%s43_s1] sm:$0xff] %v12_v4  ;;  %15 = vst [vmem:[%s43_s1 + $0x8] sm:$0xff] %v13_v5 }

</bundles_post_ra>
